<compile_context>
chip_gen: v7x
topology: tpu7x:2x2x1
jax: 0.10.0
libtpu: 0.0.40
codegen_flags: <defaults>
</compile_context>

<pallas_src>
import functools

import jax
import jax.numpy as jnp
from jax import lax
from jax.experimental import pallas as pl
from jax.experimental.pallas import tpu as pltpu

_EPS = 1e-5  # PyTorch BatchNorm default eps


def _round_up8(n):
    return ((n + 7) // 8) * 8


def _make_kernel(C, Cp, P, n_lane, bblk):
    """Fused SpatialGCN body for static sizes.

    C      : inter_plane (real channels)
    Cp     : sublane-padded inter_plane (round_up8(C))
    P      : plane
    n_lane : H*W lanes per image (multiple of 128)
    bblk   : images per grid step (lane width of the block = bblk * n_lane)
    """
    mm = jnp.bfloat16
    C3p = 3 * Cp

    def kernel(x_ref, wkvq_ref, wwg_ref, wout_ref, bias_ref, o_ref, av_sc):
        # --- fused K/V/Q 1x1 convs, lane-wide over all bblk images ---------
        # (3Cp, P) @ (P, bblk*n_lane), f32 accumulation on the MXU.
        kvq = jnp.dot(wkvq_ref[...], x_ref[...],
                      preferred_element_type=jnp.float32)
        kvq = kvq + bias_ref[0:C3p, :]            # (3Cp, 1) broadcast over lanes

        # Sublane-aligned (Cp multiple of 8) slices: zero-cost views.
        k = kvq[0:Cp].astype(mm)
        v = kvq[Cp:2 * Cp].astype(mm)
        q = kvq[2 * Cp:3 * Cp].astype(mm)

        if Cp != C:   # mask for the zero-padded channels (static condition)
            col = lax.broadcasted_iota(jnp.int32, (Cp, Cp), 1)
            pad_mask = col < C

        # --- per-image attention: A = q.v^T, softmax, av = S^T.k -----------
        for bi in range(bblk):                    # static unroll, bblk small
            lo = bi * n_lane
            hi = lo + n_lane
            q_b = q[:, lo:hi]
            v_b = v[:, lo:hi]
            k_b = k[:, lo:hi]

            # A[i, j] = sum_n q[i, n] * v[j, n]   (torch: bmm(node_q, node_v))
            a = pl.dot(q_b, v_b, trans_b=True).astype(jnp.float32)   # (Cp, Cp)
            if Cp != C:
                a = jnp.where(pad_mask, a, jnp.float32(-1e30))

            # Exact softmax over the last axis (tiny (Cp, Cp) tile -> exact div).
            a = a - jnp.max(a, axis=-1, keepdims=True)
            e = jnp.exp(a)
            s = e / jnp.sum(e, axis=-1, keepdims=True)

            # av[j, n] = sum_i S[i, j] * k[i, n]  (torch: bmm(node_k, S), ch-first)
            av_b = lax.dot_general(s.astype(mm), k_b,
                                   (((0,), (0,)), ((), ())),
                                   preferred_element_type=jnp.float32)
            av_sc[:, lo:hi] = av_b                # lane-aligned scratch store

        av = av_sc[...].astype(mm)                # (Cp, bblk*n_lane)

        # --- conv_wg (bn_wg folded) + out conv (BatchNorm2d folded) --------
        y = jnp.dot(wwg_ref[...], av, preferred_element_type=jnp.float32)
        z = jnp.dot(wout_ref[...], y.astype(mm),
                    preferred_element_type=jnp.float32)
        z = z + bias_ref[C3p:C3p + P, :]

        # --- residual + ReLU: re-read x only here; f32 math, bf16 store ----
        z = z + x_ref[...].astype(jnp.float32)
        o_ref[...] = jnp.maximum(z, 0.0).astype(o_ref.dtype)

    return kernel


@functools.partial(jax.jit, static_argnames=("bblk",))
def spatial_gcn(x_nchw, kp, *, bblk=None):
    """x_nchw: (B, plane, H, W) float32.  Returns (B, plane, H, W) bfloat16."""
    B, P, H, W = x_nchw.shape
    N = H * W
    assert N % 128 == 0, "H*W must be a multiple of 128"
    # TODO(synk): generic spatial padding + lane masking for H*W % 128 != 0.
    if bblk is None:
        bblk = B
    assert B % bblk == 0
    num_blk = B // bblk
    L = bblk * N

    C = P // 2                      # inter_plane, by module construction
    Cp = _round_up8(C)
    assert kp["wwg"].shape == (Cp, Cp)

    # Channels-first slab: lanes index (image, pixel) -> one wide matmul.
    x = x_nchw.astype(jnp.bfloat16).reshape(B, P, N)
    x = jnp.transpose(x, (1, 0, 2)).reshape(P, B * N)

    kernel = _make_kernel(C, Cp, P, N, bblk)
    const = lambda shape: pl.BlockSpec(shape, lambda g: (0, 0))

    out = pl.pallas_call(
        kernel,
        out_shape=jax.ShapeDtypeStruct((P, B * N), jnp.bfloat16),
        grid_spec=pltpu.PrefetchScalarGridSpec(
            num_scalar_prefetch=0,
            grid=(num_blk,),
            in_specs=[
                pl.BlockSpec((P, L), lambda g: (0, g)),   # x (bf16)
                const((3 * Cp, P)),                       # fused K/V/Q weight
                const((Cp, Cp)),                          # conv_wg (BN-folded)
                const((P, Cp)),                           # out conv (BN-folded)
                const((3 * Cp + P, 1)),                   # packed biases (f32)
            ],
            out_specs=pl.BlockSpec((P, L), lambda g: (0, g)),
            scratch_shapes=[pltpu.VMEM((Cp, L), jnp.float32)],
        ),
        compiler_params=pltpu.CompilerParams(
            # v5e/v6e are single-TC; on v7x use bblk=B//2 + CORE_PARALLEL (see TODO).
            dimension_semantics=("parallel",),
            # Above v5e's 16 MiB scoped default, within v7x's 64 MiB physical VMEM.
            vmem_limit_bytes=32 * 1024 * 1024,
        ),
    )(x, kp["wkvq"], kp["wwg"], kp["wout"], kp["bias"])

    out = out.reshape(P, B, N).transpose(1, 0, 2)
    return out.reshape(B, P, H, W)


def _fold_params(p, mm_dtype=jnp.bfloat16):
    """Host-side: fuse K/V/Q (sublane-padded), fold both BatchNorms (inference)
    into the convs, pack the remaining bias vectors into one array."""
    C = p["wwg"].shape[0]
    plane = p["wout"].shape[0]
    Cp = _round_up8(C)

    def pad_rows(w):          # (C, plane) -> (Cp, plane), zero rows appended
        return jnp.zeros((Cp, w.shape[1]), jnp.float32).at[:C].set(w)

    def pad_vec(b):           # (C,) -> (Cp,)
        return jnp.zeros((Cp,), jnp.float32).at[:C].set(b)

    wkvq = jnp.concatenate([pad_rows(p["wk"]), pad_rows(p["wv"]),
                            pad_rows(p["wq"])], axis=0)            # (3Cp, plane)
    bkvq = jnp.concatenate([pad_vec(p["bk"]), pad_vec(p["bv"]),
                            pad_vec(p["bq"])], axis=0)             # (3Cp,)

    # bn_wg: y = s1 * (Wwg @ av) + t1
    s1 = p["g1"] * lax.rsqrt(p["rv1"] + _EPS)
    t1 = p["be1"] - p["rm1"] * s1
    wwg_f = s1[:, None] * p["wwg"]                                 # (C, C)
    wwg_pad = jnp.zeros((Cp, Cp), jnp.float32).at[:C, :C].set(wwg_f)

    # out BatchNorm2d: z = s2 * (Wout @ y + bout) + t2
    s2 = p["g2"] * lax.rsqrt(p["rv2"] + _EPS)
    t2 = p["be2"] - p["rm2"] * s2
    wout_f = s2[:, None] * p["wout"]                               # (plane, C)
    bout_f = wout_f @ t1 + s2 * p["bout"] + t2                     # t1 folded downstream
    wout_pad = jnp.zeros((plane, Cp), jnp.float32).at[:, :C].set(wout_f)

    bias = jnp.concatenate([bkvq, bout_f])[:, None].astype(jnp.float32)

    return {
        "wkvq": wkvq.astype(mm_dtype),
        "wwg": wwg_pad.astype(mm_dtype),
        "wout": wout_pad.astype(mm_dtype),
        "bias": bias,
    }


def _reference(x_nchw, p):
    """Pure-JAX mirror of the PyTorch forward (inference-mode BN), all f32."""
    B, P, H, W = x_nchw.shape
    x = x_nchw.reshape(B, P, H * W)
    k = jnp.einsum("cp,bpn->bcn", p["wk"], x) + p["bk"][None, :, None]
    v = jnp.einsum("cp,bpn->bcn", p["wv"], x) + p["bv"][None, :, None]
    q = jnp.einsum("cp,bpn->bcn", p["wq"], x) + p["bq"][None, :, None]
    A = jnp.einsum("bin,bjn->bij", q, v)
    S = jax.nn.softmax(A, axis=-1)
    av = jnp.einsum("bin,bij->bjn", k, S)
    avw = jnp.einsum("oc,bcn->bon", p["wwg"], av)
    y = ((avw - p["rm1"][None, :, None]) * lax.rsqrt(p["rv1"] + _EPS)[None, :, None]
         * p["g1"][None, :, None] + p["be1"][None, :, None])
    out = jnp.einsum("pc,bcn->bpn", p["wout"], y) + p["bout"][None, :, None]
    z = ((out - p["rm2"][None, :, None]) * lax.rsqrt(p["rv2"] + _EPS)[None, :, None]
         * p["g2"][None, :, None] + p["be2"][None, :, None])
    return jnp.maximum(z + x, 0.0).reshape(B, P, H, W)


def _make_raw_params(key, plane):
    C = plane // 2
    ks = jax.random.split(key, 20)
    n = lambda k, s: jax.random.normal(k, s, jnp.float32) * 0.1
    return {
        "wk": n(ks[0], (C, plane)), "bk": n(ks[1], (C,)),
        "wv": n(ks[2], (C, plane)), "bv": n(ks[3], (C,)),
        "wq": n(ks[4], (C, plane)), "bq": n(ks[5], (C,)),
        "wwg": n(ks[6], (C, C)),
        "g1": 1.0 + n(ks[7], (C,)), "be1": n(ks[8], (C,)),
        "rm1": n(ks[9], (C,)),
        "rv1": 0.5 + jax.random.uniform(ks[10], (C,), jnp.float32),
        "wout": n(ks[11], (plane, C)), "bout": n(ks[12], (plane,)),
        "g2": 1.0 + n(ks[13], (plane,)), "be2": n(ks[14], (plane,)),
        "rm2": n(ks[15], (plane,)),
        "rv2": 0.5 + jax.random.uniform(ks[16], (plane,), jnp.float32),
    }


if __name__ == "__main__":
    key = jax.random.PRNGKey(0)
    kx, kparam = jax.random.split(key)

    B, plane, H, W = 2, 8, 16, 16          # N = H*W = 256 (lane-dense)
    x = jax.random.normal(kx, (B, plane, H, W), jnp.float32)

    raw = _make_raw_params(kparam, plane)
    kernel_params = _fold_params(raw)      # BN fold + padded QKV fuse + bias pack

    out = jax.block_until_ready(spatial_gcn(x, kernel_params))
    ref = _reference(x, raw)

    # bf16 activations + bf16 MXU operands (f32 accumulation) vs f32 reference.
    out_f32 = out.astype(jnp.float32)
    if not jnp.allclose(out_f32, ref, atol=5e-2, rtol=5e-2):
        err = float(jnp.max(jnp.abs(out_f32 - ref)))
        raise AssertionError(f"Pallas kernel does not match reference (max abs err {err:.4e})")

    print("KERNEL_OK")
</pallas_src>

<mosaic_0001>
module attributes {stable_mosaic.version = 11 : i64} {
  func.func @kernel(%arg0: i32, %arg1: memref<8x512xbf16, #tpu.memory_space<vmem>>, %arg2: memref<24x8xbf16, #tpu.memory_space<vmem>>, %arg3: memref<8x8xbf16, #tpu.memory_space<vmem>>, %arg4: memref<8x8xbf16, #tpu.memory_space<vmem>>, %arg5: memref<32x1xf32, #tpu.memory_space<vmem>>, %arg6: memref<8x512xbf16, #tpu.memory_space<vmem>>, %arg7: memref<8x512xf32, #tpu.memory_space<vmem>>) attributes {dimension_semantics = [#tpu.dimension_semantics<parallel>], iteration_bounds = array<i64: 1>, scalar_prefetch = 0 : i64, scratch_operands = 1 : i64, tpu.core_type = #tpu.core_type<tc>, window_params = [{transform_indices = @transform_0, window_bounds = array<i64: 8, 512>}, {pipeline_mode = #tpu.pipeline_mode<synchronous>, transform_indices = @transform_1, window_bounds = array<i64: 24, 8>}, {pipeline_mode = #tpu.pipeline_mode<synchronous>, transform_indices = @transform_2, window_bounds = array<i64: 8, 8>}, {pipeline_mode = #tpu.pipeline_mode<synchronous>, transform_indices = @transform_3, window_bounds = array<i64: 8, 8>}, {pipeline_mode = #tpu.pipeline_mode<synchronous>, transform_indices = @transform_4, window_bounds = array<i64: 32, 1>}, {transform_indices = @transform_5, window_bounds = array<i64: 8, 512>}]} {
    %c0 = arith.constant 0 : index
    %c0_0 = arith.constant 0 : index
    %0 = vector.load %arg2[%c0, %c0_0] : memref<24x8xbf16, #tpu.memory_space<vmem>>, vector<24x8xbf16>
    %c0_1 = arith.constant 0 : index
    %c0_2 = arith.constant 0 : index
    %1 = vector.load %arg1[%c0_1, %c0_2] : memref<8x512xbf16, #tpu.memory_space<vmem>>, vector<8x512xbf16>
    %cst = arith.constant dense<0.000000e+00> : vector<24x512xf32>
    %2 = tpu.matmul %0, %1, %cst {dimension_numbers = #tpu.dot_dimension_numbers<[1], [0], [0], [1], [0, 0, 1, 1], [], []>} : vector<24x8xbf16>, vector<8x512xbf16>, vector<24x512xf32> -> vector<24x512xf32>
    %c0_3 = arith.constant 0 : index
    %c0_4 = arith.constant 0 : index
    %3 = vector.load %arg5[%c0_3, %c0_4] : memref<32x1xf32, #tpu.memory_space<vmem>>, vector<24x1xf32>
    %4 = vector.broadcast %3 : vector<24x1xf32> to vector<24x512xf32>
    %5 = arith.addf %2, %4 : vector<24x512xf32>
    %6 = vector.extract_strided_slice %5 {offsets = [0, 0], sizes = [8, 512], strides = [1, 1]} : vector<24x512xf32> to vector<8x512xf32>
    %7 = arith.truncf %6 : vector<8x512xf32> to vector<8x512xbf16>
    %8 = vector.extract_strided_slice %5 {offsets = [8, 0], sizes = [8, 512], strides = [1, 1]} : vector<24x512xf32> to vector<8x512xf32>
    %9 = arith.truncf %8 : vector<8x512xf32> to vector<8x512xbf16>
    %10 = vector.extract_strided_slice %5 {offsets = [16, 0], sizes = [8, 512], strides = [1, 1]} : vector<24x512xf32> to vector<8x512xf32>
    %11 = arith.truncf %10 : vector<8x512xf32> to vector<8x512xbf16>
    %12 = tpu.iota {dimensions = array<i32: 1>} : vector<8x8xi32>
    %c4_i32 = arith.constant 4 : i32
    %13 = vector.broadcast %c4_i32 : i32 to vector<8x8xi32>
    %14 = arith.cmpi slt, %12, %13 : vector<8x8xi32>
    %15 = vector.extract_strided_slice %11 {offsets = [0, 0], sizes = [8, 256], strides = [1, 1]} : vector<8x512xbf16> to vector<8x256xbf16>
    %16 = vector.extract_strided_slice %9 {offsets = [0, 0], sizes = [8, 256], strides = [1, 1]} : vector<8x512xbf16> to vector<8x256xbf16>
    %17 = vector.extract_strided_slice %7 {offsets = [0, 0], sizes = [8, 256], strides = [1, 1]} : vector<8x512xbf16> to vector<8x256xbf16>
    %cst_5 = arith.constant dense<0.000000e+00> : vector<8x8xf32>
    %18 = tpu.matmul %15, %16, %cst_5 {dimension_numbers = #tpu.dot_dimension_numbers<[1], [1], [0], [0], [0, 0, 1, 0], [], []>} : vector<8x256xbf16>, vector<8x256xbf16>, vector<8x8xf32> -> vector<8x8xf32>
    %cst_6 = arith.constant -1.000000e+30 : f32
    %19 = vector.broadcast %cst_6 : f32 to vector<8x8xf32>
    %20 = arith.select %14, %18, %19 : vector<8x8xi1>, vector<8x8xf32>
    %cst_7 = arith.constant dense<0xFF800000> : vector<8xf32>
    %21 = vector.multi_reduction <maximumf>, %20, %cst_7 [1] : vector<8x8xf32> to vector<8xf32>
    %22 = vector.shape_cast %21 : vector<8xf32> to vector<8x1xf32>
    %23 = vector.broadcast %22 : vector<8x1xf32> to vector<8x8xf32>
    %24 = arith.subf %20, %23 : vector<8x8xf32>
    %25 = math.exp %24 : vector<8x8xf32>
    %cst_8 = arith.constant dense<0.000000e+00> : vector<8xf32>
    %26 = vector.multi_reduction <add>, %25, %cst_8 [1] : vector<8x8xf32> to vector<8xf32>
    %27 = vector.shape_cast %26 : vector<8xf32> to vector<8x1xf32>
    %28 = vector.broadcast %27 : vector<8x1xf32> to vector<8x8xf32>
    %29 = arith.divf %25, %28 : vector<8x8xf32>
    %30 = arith.truncf %29 : vector<8x8xf32> to vector<8x8xbf16>
    %cst_9 = arith.constant dense<0.000000e+00> : vector<8x256xf32>
    %31 = tpu.matmul %30, %17, %cst_9 {dimension_numbers = #tpu.dot_dimension_numbers<[0], [0], [1], [1], [0, 1, 1, 1], [], []>} : vector<8x8xbf16>, vector<8x256xbf16>, vector<8x256xf32> -> vector<8x256xf32>
    %c0_10 = arith.constant 0 : index
    %c0_11 = arith.constant 0 : index
    %32 = vector.load %arg7[%c0_10, %c0_11] : memref<8x512xf32, #tpu.memory_space<vmem>>, vector<8x256xf32>
    tpu.vector_store %arg7[%c0_10, %c0_11], %31 {strides = array<i32>} : memref<8x512xf32, #tpu.memory_space<vmem>>, vector<8x256xf32>,
    %33 = vector.extract_strided_slice %11 {offsets = [0, 256], sizes = [8, 256], strides = [1, 1]} : vector<8x512xbf16> to vector<8x256xbf16>
    %34 = vector.extract_strided_slice %9 {offsets = [0, 256], sizes = [8, 256], strides = [1, 1]} : vector<8x512xbf16> to vector<8x256xbf16>
    %35 = vector.extract_strided_slice %7 {offsets = [0, 256], sizes = [8, 256], strides = [1, 1]} : vector<8x512xbf16> to vector<8x256xbf16>
    %cst_12 = arith.constant dense<0.000000e+00> : vector<8x8xf32>
    %36 = tpu.matmul %33, %34, %cst_12 {dimension_numbers = #tpu.dot_dimension_numbers<[1], [1], [0], [0], [0, 0, 1, 0], [], []>} : vector<8x256xbf16>, vector<8x256xbf16>, vector<8x8xf32> -> vector<8x8xf32>
    %cst_13 = arith.constant -1.000000e+30 : f32
    %37 = vector.broadcast %cst_13 : f32 to vector<8x8xf32>
    %38 = arith.select %14, %36, %37 : vector<8x8xi1>, vector<8x8xf32>
    %cst_14 = arith.constant dense<0xFF800000> : vector<8xf32>
    %39 = vector.multi_reduction <maximumf>, %38, %cst_14 [1] : vector<8x8xf32> to vector<8xf32>
    %40 = vector.shape_cast %39 : vector<8xf32> to vector<8x1xf32>
    %41 = vector.broadcast %40 : vector<8x1xf32> to vector<8x8xf32>
    %42 = arith.subf %38, %41 : vector<8x8xf32>
    %43 = math.exp %42 : vector<8x8xf32>
    %cst_15 = arith.constant dense<0.000000e+00> : vector<8xf32>
    %44 = vector.multi_reduction <add>, %43, %cst_15 [1] : vector<8x8xf32> to vector<8xf32>
    %45 = vector.shape_cast %44 : vector<8xf32> to vector<8x1xf32>
    %46 = vector.broadcast %45 : vector<8x1xf32> to vector<8x8xf32>
    %47 = arith.divf %43, %46 : vector<8x8xf32>
    %48 = arith.truncf %47 : vector<8x8xf32> to vector<8x8xbf16>
    %cst_16 = arith.constant dense<0.000000e+00> : vector<8x256xf32>
    %49 = tpu.matmul %48, %35, %cst_16 {dimension_numbers = #tpu.dot_dimension_numbers<[0], [0], [1], [1], [0, 1, 1, 1], [], []>} : vector<8x8xbf16>, vector<8x256xbf16>, vector<8x256xf32> -> vector<8x256xf32>
    %c0_17 = arith.constant 0 : index
    %c256 = arith.constant 256 : index
    %50 = vector.load %arg7[%c0_17, %c256] : memref<8x512xf32, #tpu.memory_space<vmem>>, vector<8x256xf32>
    tpu.vector_store %arg7[%c0_17, %c256], %49 {strides = array<i32>} : memref<8x512xf32, #tpu.memory_space<vmem>>, vector<8x256xf32>,
    %c0_18 = arith.constant 0 : index
    %c0_19 = arith.constant 0 : index
    %51 = vector.load %arg7[%c0_18, %c0_19] : memref<8x512xf32, #tpu.memory_space<vmem>>, vector<8x512xf32>
    %52 = arith.truncf %51 : vector<8x512xf32> to vector<8x512xbf16>
    %c0_20 = arith.constant 0 : index
    %c0_21 = arith.constant 0 : index
    %53 = vector.load %arg3[%c0_20, %c0_21] : memref<8x8xbf16, #tpu.memory_space<vmem>>, vector<8x8xbf16>
    %cst_22 = arith.constant dense<0.000000e+00> : vector<8x512xf32>
    %54 = tpu.matmul %53, %52, %cst_22 {dimension_numbers = #tpu.dot_dimension_numbers<[1], [0], [0], [1], [0, 0, 1, 1], [], []>} : vector<8x8xbf16>, vector<8x512xbf16>, vector<8x512xf32> -> vector<8x512xf32>
    %c0_23 = arith.constant 0 : index
    %c0_24 = arith.constant 0 : index
    %55 = vector.load %arg4[%c0_23, %c0_24] : memref<8x8xbf16, #tpu.memory_space<vmem>>, vector<8x8xbf16>
    %56 = arith.truncf %54 : vector<8x512xf32> to vector<8x512xbf16>
    %cst_25 = arith.constant dense<0.000000e+00> : vector<8x512xf32>
    %57 = tpu.matmul %55, %56, %cst_25 {dimension_numbers = #tpu.dot_dimension_numbers<[1], [0], [0], [1], [0, 0, 1, 1], [], []>} : vector<8x8xbf16>, vector<8x512xbf16>, vector<8x512xf32> -> vector<8x512xf32>
    %c24 = arith.constant 24 : index
    %c0_26 = arith.constant 0 : index
    %58 = vector.load %arg5[%c24, %c0_26] : memref<32x1xf32, #tpu.memory_space<vmem>>, vector<8x1xf32>
    %59 = vector.broadcast %58 : vector<8x1xf32> to vector<8x512xf32>
    %60 = arith.addf %57, %59 : vector<8x512xf32>
    %c0_27 = arith.constant 0 : index
    %c0_28 = arith.constant 0 : index
    %61 = vector.load %arg1[%c0_27, %c0_28] : memref<8x512xbf16, #tpu.memory_space<vmem>>, vector<8x512xbf16>
    %62 = arith.extf %61 : vector<8x512xbf16> to vector<8x512xf32>
    %63 = arith.addf %60, %62 : vector<8x512xf32>
    %cst_29 = arith.constant 0.000000e+00 : f32
    %64 = vector.broadcast %cst_29 : f32 to vector<8x512xf32>
    %65 = arith.maximumf %63, %64 : vector<8x512xf32>
    %66 = arith.truncf %65 : vector<8x512xf32> to vector<8x512xbf16>
    %c0_30 = arith.constant 0 : index
    %c0_31 = arith.constant 0 : index
    %67 = vector.load %arg6[%c0_30, %c0_31] : memref<8x512xbf16, #tpu.memory_space<vmem>>, vector<8x512xbf16>
    tpu.vector_store %arg6[%c0_30, %c0_31], %66 {strides = array<i32>} : memref<8x512xbf16, #tpu.memory_space<vmem>>, vector<8x512xbf16>,
    return
  }
  func.func @transform_0(%arg0: i32) -> (i32, i32) {
    %c0_i32 = arith.constant 0 : i32
    %c0_i32_0 = arith.constant 0 : i32
    return %c0_i32, %arg0 : i32, i32
  }
  func.func @transform_1(%arg0: i32) -> (i32, i32) {
    %c0_i32 = arith.constant 0 : i32
    %c0_i32_0 = arith.constant 0 : i32
    %c0_i32_1 = arith.constant 0 : i32
    return %c0_i32, %c0_i32_0 : i32, i32
  }
  func.func @transform_2(%arg0: i32) -> (i32, i32) {
    %c0_i32 = arith.constant 0 : i32
    %c0_i32_0 = arith.constant 0 : i32
    %c0_i32_1 = arith.constant 0 : i32
    return %c0_i32, %c0_i32_0 : i32, i32
  }
  func.func @transform_3(%arg0: i32) -> (i32, i32) {
    %c0_i32 = arith.constant 0 : i32
    %c0_i32_0 = arith.constant 0 : i32
    %c0_i32_1 = arith.constant 0 : i32
    return %c0_i32, %c0_i32_0 : i32, i32
  }
  func.func @transform_4(%arg0: i32) -> (i32, i32) {
    %c0_i32 = arith.constant 0 : i32
    %c0_i32_0 = arith.constant 0 : i32
    %c0_i32_1 = arith.constant 0 : i32
    return %c0_i32, %c0_i32_0 : i32, i32
  }
  func.func @transform_5(%arg0: i32) -> (i32, i32) {
    %c0_i32 = arith.constant 0 : i32
    %c0_i32_0 = arith.constant 0 : i32
    return %c0_i32, %arg0 : i32, i32
  }
}

</mosaic_0001>

<bundles_post_ra>
// kernel: spatial_gcn.1
= control target key start
LH: loop header
LB: loop body
LE: loop exit
PB: predicated region body
PF: predicated region fallthrough
CT: control target
= control target key end

     0   :  { %vm69_vm0 = vcmask 1043456   ;;  %v736_v2 = vmov 0   ;;  %vm62_vm1 = vcmask 64512   ;;  %v196_v47 = vlaneseq  ;;  %s873_s0 = inlined_call_operand.vmem [shape: bf16[8,512], index: 0, kind: input, shape index: {}]   ;;  %s874_s1 = inlined_call_operand.vmem [shape: bf16[24,8], index: 1, kind: input, shape index: {}]   ;;  %s875_s4 = inlined_call_operand.vmem [shape: f32[32,1], index: 4, kind: input, shape index: {}]   ;;  %s876_s2 = inlined_call_operand.vmem [shape: bf16[8,8], index: 2, kind: input, shape index: {}]   ;;  %s877_s3 = inlined_call_operand.vmem [shape: bf16[8,8], index: 3, kind: input, shape index: {}]   ;;  %s878_s5 = inlined_call_operand.vmem [shape: bf16[8,512], index: 5, kind: output, shape index: {}]  }
   0x1   :  { %v770_v0 = vld [vmem:[%s873_s0] sm:$0xff]  ;;  %v775_v1 = vld [vmem:[%s873_s0 + $0x8] sm:$0xff]  ;;  %114 = vmatprep.mubr.bf16.mxu0 %v736_v2  ;;  %165 = vmatprep.mubr.bf16.mxu1 %v736_v2  ;;  %v28_v11 = vld [vmem:[%s875_s4 + $0x10] sm:$0xff] }
   0x2   :  { %v694_v3 = vcombine.high %v770_v0, %v770_v0  ;;  %v696_v4 = vcombine.high %v775_v1, %v775_v1  ;;  %v693_v5 = vcombine.low %v770_v0, %v770_v0  ;;  %v695_v6 = vcombine.low %v775_v1, %v775_v1  ;;  %720 = vset.pattern.permute.xlu0 %v736_v2  ;;  %v27_v7 = vld [vmem:[%s875_s4 + $0x8] sm:$0xff]  ;;  %v726_v10 = vld [vmem:[%s874_s1] sm:$0xff]  }
   0x3   :  { %721 = vset.pattern.permute.xlu1 %v736_v2  ;;  %36 = vperm.xlu0 %720, %v27_v7   ;;  %v727_v12 = vld [vmem:[%s874_s1 + $0x8] ss:$0 sps:$4 sm:$0xff]   ;;  %v197_v48 = vand.u32 127, %v196_v47 }
   0x4   :  { %697 = vmatprep.subr.msk.bf16.mxu0 %vm69_vm0, %v694_v3  ;;  %700 = vmatprep.subr.msk.bf16.mxu1 %vm69_vm0, %v696_v4  ;;  %v71_v8 = vsel %vm69_vm0, %v693_v5, 0  ;;  %v77_v9 = vsel %vm69_vm0, %v695_v6, 0 }
   0x5   :  { %83 = vmatpush1.bf16.msra.mxu0 %v71_v8  ;;  %134 = vmatpush1.bf16.msra.mxu1 %v77_v9  ;;  %vm198_vm2 = vcmp.lt.s32.totalorder %v197_v48, 4 }
   0x7   :  { %41 = vperm.xlu0 %720, %v28_v11  }
   0x8   :  { %698 = vmatmul.mubr.msk.bf16.vlgmr.msra.gmra.mrb[0].mxu0 %vm62_vm1, %v726_v10  ;;  %701 = vmatmul.mubr.msk.bf16.vlgmr.msra.gmra.mrb[0].mxu1 %vm62_vm1, %v726_v10  ;;  %v26_v10 = vld [vmem:[%s875_s4] sm:$0xff] }
   0x9   :  { %124 = vmatprep.mubr.bf16.mxu0 %v736_v2  ;;  %175 = vmatprep.mubr.bf16.mxu1 %v736_v2 }
  0x10   :  { %699 = vmatmul.mubr.msk.bf16.gmra.mrb[4].mxu0 %vm62_vm1, %v727_v12  ;;  %702 = vmatmul.mubr.msk.bf16.gmra.mrb[4].mxu1 %vm62_vm1, %v727_v12 }
  0x11   :  { %309 = vmatprep.mubr.bf16.mxu1 %v736_v2 }
  0x82   :  { %v37_v13 = vpop.permute.xlu0 %36 }
  0x86   :  { %v42_v27 = vpop.permute.xlu0 %41 }
  0xdb   :  { %v812_v14 = vpop.f32.mrb[0].mxu0  ;;  %v814_v15 = vpop.f32.mrb[0].mxu1 }
  0xdc   :  { %v816_v16 = vpop.f32.mrb[1].mxu0  ;;  %v818_v17 = vpop.f32.mrb[1].mxu1 }
  0xdd   :  { %v120_v18 = vpop.f32.mrb[2].mxu0  ;;  %v171_v19 = vpop.f32.mrb[2].mxu1 }
  0xde   :  { %v121_v20 = vadd.f32 %v120_v18, %v37_v13  ;;  %v122_v21 = vpop.f32.mrb[3].mxu0  ;;  %v173_v22 = vpop.f32.mrb[3].mxu1  ;;  %v172_v37 = vadd.f32 %v171_v19, %v37_v13 }
  0xdf   :  { %v123_v23 = vadd.f32 %v122_v21, %v37_v13  ;;  %v174_v24 = vadd.f32 %v173_v22, %v37_v13 }
  0xe0   :  { %v188_v26 = vpack.c.bf16 %v121_v20, %v121_v20  ;;  %v190_v43 = vpack.c.bf16 %v172_v37, %v172_v37 }
  0xe1   :  { %v189_v25 = vpack.c.bf16 %v123_v23, %v123_v23  ;;  %v191_v28 = vpack.c.bf16 %v174_v24, %v174_v24 }
  0xe3   :  { %v126_v29 = vpop.f32.mrb[4].mxu0  ;;  %v177_v30 = vpop.f32.mrb[4].mxu1  ;;  %199 = vmatprep.subr.bf16.mxu0 %v189_v25 }
  0xe4   :  { %v128_v31 = vpop.f32.mrb[5].mxu0  ;;  %v179_v32 = vpop.f32.mrb[5].mxu1  ;;  %200 = vmatpush1.bf16.xpose.msra.mxu0 %v188_v26  ;;  %v127_v33 = vadd.f32 %v126_v29, %v42_v27  ;;  %v178_v45 = vadd.f32 %v177_v30, %v42_v27 }
  0xe5   :  { %v129_v34 = vadd.f32 %v128_v31, %v42_v27  ;;  %320 = vmatprep.subr.bf16.mxu0 %v191_v28  ;;  %v130_v35 = vpop.f32.mrb[6].mxu0  ;;  %v181_v36 = vpop.f32.mrb[6].mxu1  ;;  %v180_v38 = vadd.f32 %v179_v32, %v42_v27  ;;  %v552_v28 = vld [vmem:[%s875_s4 + $0x18] sm:$0xff] }
  0xe6   :  { %v131_v39 = vpop.f32.mrb[7].mxu0  ;;  %v182_v40 = vpop.f32.mrb[7].mxu1  ;;  %v192_v42 = vpack.c.bf16 %v127_v33, %v127_v33  ;;  %v194_v46 = vpack.c.bf16 %v178_v45, %v178_v45 }
  0xe7   :  { %v193_v41 = vpack.c.bf16 %v129_v34, %v129_v34  ;;  %v195_v44 = vpack.c.bf16 %v180_v38, %v180_v38  ;;  %v449_v40 = vld [vmem:[%s876_s2] sm:$0xf] }
  0xe9   :  { %231 = vmatprep.mubr.bf16.mxu0 %v193_v41 }
  0xeb   :  { %232 = vmatmul.mubr.bf16.vlgmr.msra.gmra.mrb[8].mxu0 %v192_v42 }
  0xec   :  { %321 = vmatpush1.bf16.xpose.msra.mxu0 %v190_v43  ;;  %352 = vmatprep.mubr.bf16.mxu0 %v195_v44 }
  0xf3   :  { %353 = vmatmul.mubr.bf16.vlgmr.msra.gmra.mrb[12].mxu0 %v194_v46 }
  0xf4   :  { %497 = vmatprep.mubr.bf16.mxu0 %v736_v2 }
 0x1be   :  { %v233_v49 = vpop.f32.mrb[8].mxu0 }
 0x1bf   :  { %v239_v50 = vsel %vm198_vm2, %v233_v49, -1e+30  ;;  %v235_v51 = vpop.f32.mrb[9].mxu0 }
 0x1c0   :  { %v236_v52 = vpop.f32.mrb[10].mxu0  ;;  %v240_v53 = vsel %vm62_vm1, %v239_v50, -inf }
 0x1c1   :  { %241 = vmax.xlane.f32.xlu1 %v240_v53  ;;  %v237_v54 = vpop.f32.mrb[11].mxu0 }
 0x1c6   :  { %v354_v55 = vpop.f32.mrb[12].mxu0 }
 0x1c7   :  { %v360_v56 = vsel %vm198_vm2, %v354_v55, -1e+30  ;;  %v356_v57 = vpop.f32.mrb[13].mxu0  ;;  %v547_v55 = vld [vmem:[%s877_s3] sm:$0xf] }
 0x1c8   :  { %v357_v58 = vpop.f32.mrb[14].mxu0  ;;  %v361_v59 = vsel %vm62_vm1, %v360_v56, -inf }
 0x1c9   :  { %362 = vmax.xlane.f32.xlu1 %v361_v59  ;;  %v358_v60 = vpop.f32.mrb[15].mxu0 }
 0x24e   :  { %v242_v61 = vpop.xlane.xlu1 %241 }
 0x24f   :  { %v243_v62 = vsub.f32 %v239_v50, %v242_v61 }
 0x251   :  { %v244_v63 = vmul.f32 1.442695, %v243_v62  ;;  %v657_v62 = vunpack.c.l.bf16 %v770_v0 }
 0x253   :  { %728 = vpow2.f32 %v244_v63 }
 0x256   :  { %v363_v3 = vpop.xlane.xlu1 %362 }
 0x257   :  { %v364_v4 = vsub.f32 %v360_v56, %v363_v3 }
 0x259   :  { %v365_v5 = vmul.f32 1.442695, %v364_v4  ;;  %v658_v4 = vunpack.c.h.bf16 %v770_v0 }
 0x25b   :  { %730 = vpow2.f32 %v365_v5 }
 0x25d   :  { %v729_v6 = vpop.eup %728 }
 0x25e   :  { %v246_v7 = vsel %vm62_vm1, %v729_v6, 0.0 }
 0x25f   :  { %247 = vadd.xlane.f32.xlu0 %v246_v7 }
 0x265   :  { %v731_v8 = vpop.eup %730 }
 0x266   :  { %v367_v9 = vsel %vm62_vm1, %v731_v8, 0.0 }
 0x267   :  { %368 = vadd.xlane.f32.xlu1 %v367_v9 }
 0x278   :  { %31 = vperm.xlu1 %721, %v26_v10  }
 0x2ec   :  { %v248_v11 = vpop.xlane.xlu0 %247 }
 0x2ed   :  { %732 = vrcp.f32 %v248_v11 }
 0x2f4   :  { %v369_v12 = vpop.xlane.xlu1 %368 }
 0x2f5   :  { %734 = vrcp.f32 %v369_v12 }
 0x2f7   :  { %v733_v13 = vpop.eup %732 }
 0x2f8   :  { %v32_v18 = vpop.permute.xlu1 %31  ;;  %v250_v19 = vmul.f32 %v733_v13, %v729_v6 }
 0x2f9   :  { %v117_v20 = vadd.f32 %v812_v14, %v32_v18  ;;  %v119_v21 = vadd.f32 %v816_v16, %v32_v18  ;;  %v170_v22 = vadd.f32 %v818_v17, %v32_v18  ;;  %v168_v17 = vadd.f32 %v814_v15, %v32_v18 }
 0x2fa   :  { %v251_v23 = vpack.c.bf16 %v250_v19, %v250_v19  ;;  %v659_v18 = vunpack.c.l.bf16 %v775_v1 }
 0x2fb   :  { %v185_v24 = vpack.c.bf16 %v119_v21, %v119_v21  ;;  %v184_v25 = vpack.c.bf16 %v117_v20, %v117_v20  ;;  %v187_v26 = vpack.c.bf16 %v170_v22, %v170_v22  ;;  %v186_v30 = vpack.c.bf16 %v168_v17, %v168_v17 }
 0x2fc   :  { %252 = vxpose.xlu1.c.b16.start.end [1/1] (short) (narrow) %v251_v23, 16  ;;  %v660_v21 = vunpack.c.h.bf16 %v775_v1 }
 0x2fd   :  { %703 = vmatprep.subr.msk.bf16.mxu1 %vm69_vm0, %v185_v24  ;;  %v272_v27 = vsel %vm69_vm0, %v184_v25, 0  ;;  %v393_v32 = vsel %vm69_vm0, %v186_v30, 0 }
 0x2fe   :  { %278 = vmatpush1.bf16.msra.mxu1 %v272_v27 }
 0x2ff   :  { %v735_v29 = vpop.eup %734  ;;  %705 = vmatprep.subr.msk.bf16.mxu1 %vm69_vm0, %v187_v26 }
 0x300   :  { %555 = vperm.xlu1 %721, %v552_v28   ;;  %v371_v14 = vmul.f32 %v735_v29, %v731_v8 }
 0x302   :  { %v372_v16 = vpack.c.bf16 %v371_v14, %v371_v14 }
 0x304   :  { %373 = vxpose.xlu0.c.b16.start.end [1/1] (short) (narrow) %v372_v16, 16 }
 0x362   :  { %v260_v31 = vpop.trf.xlu1 }
 0x363   :  { %704 = vmatmul.mubr.msk.bf16.vlgmr.msra.gmra.mrb[8].mxu1 %vm62_vm1, %v260_v31 }
 0x364   :  { %399 = vmatpush1.bf16.msra.mxu1 %v393_v32  ;;  %430 = vmatprep.mubr.bf16.mxu1 %v736_v2 }
 0x36a   :  { %v381_v33 = vpop.trf.xlu0 }
 0x36b   :  { %706 = vmatmul.mubr.msk.bf16.vlgmr.msra.gmra.mrb[12].mxu1 %vm62_vm1, %v381_v33 }
 0x36c   :  { %538 = vmatprep.mubr.bf16.mxu1 %v736_v2 }
 0x37f   :  { %v556_v63 = vpop.permute.xlu1 %555 }
 0x436   :  { %v311_v34 = vpop.f32.mrb[8].mxu1 }
 0x437   :  { %v445_v35 = vpack.c.bf16 %v311_v34, %v311_v34  ;;  %v313_v36 = vpop.f32.mrb[9].mxu1 }
 0x438   :  { %v446_v37 = vpack.c.bf16 %v313_v36, %v313_v36  ;;  %v315_v38 = vpop.f32.mrb[10].mxu1 }
 0x439   :  { %v454_v15 = vsel %vm69_vm0, %v445_v35, 0  ;;  %v316_v39 = vpop.f32.mrb[11].mxu1 }
 0x43a   :  { %707 = vmatprep.subr.msk.bf16.mxu0 %vm69_vm0, %v446_v37 }
 0x43b   :  { %466 = vmatpush1.bf16.msra.mxu0 %v454_v15 }
 0x43e   :  { %v432_v41 = vpop.f32.mrb[12].mxu1  ;;  %708 = vmatmul.mubr.msk.bf16.vlgmr.msra.gmra.mrb[16].mxu0 %vm62_vm1, %v449_v40 }
 0x43f   :  { %v447_v42 = vpack.c.bf16 %v432_v41, %v432_v41  ;;  %v434_v43 = vpop.f32.mrb[13].mxu1  ;;  %605 = vmatprep.mubr.bf16.mxu0 %v736_v2 }
 0x440   :  { %v448_v44 = vpack.c.bf16 %v434_v43, %v434_v43  ;;  %v436_v45 = vpop.f32.mrb[14].mxu1 }
 0x441   :  { %v460_v46 = vsel %vm69_vm0, %v447_v42, 0  ;;  %v437_v47 = vpop.f32.mrb[15].mxu1 }
 0x442   :  { %709 = vmatprep.subr.msk.bf16.mxu1 %vm69_vm0, %v448_v44 }
 0x443   :  { %507 = vmatpush1.bf16.msra.mxu1 %v460_v46 }
 0x446   :  { %710 = vmatmul.mubr.msk.bf16.vlgmr.msra.gmra.mrb[16].mxu1 %vm62_vm1, %v449_v40 }
 0x447   :  { %646 = vmatprep.mubr.bf16.mxu1 %v736_v2 }
 0x511   :  { %v499_v48 = vpop.f32.mrb[16].mxu0 }
 0x512   :  { %v548_v49 = vpack.c.bf16 %v499_v48, %v499_v48  ;;  %v501_v50 = vpop.f32.mrb[17].mxu0 }
 0x513   :  { %v549_v51 = vpack.c.bf16 %v501_v50, %v501_v50  ;;  %v503_v52 = vpop.f32.mrb[18].mxu0 }
 0x514   :  { %v562_v53 = vsel %vm69_vm0, %v548_v49, 0  ;;  %v504_v54 = vpop.f32.mrb[19].mxu0 }
 0x515   :  { %711 = vmatprep.subr.msk.bf16.mxu0 %vm69_vm0, %v549_v51 }
 0x516   :  { %574 = vmatpush1.bf16.msra.mxu0 %v562_v53 }
 0x519   :  { %v540_v56 = vpop.f32.mrb[16].mxu1  ;;  %712 = vmatmul.mubr.msk.bf16.vlgmr.msra.gmra.mrb[20].mxu0 %vm62_vm1, %v547_v55 }
 0x51a   :  { %v550_v57 = vpack.c.bf16 %v540_v56, %v540_v56  ;;  %v542_v2 = vpop.f32.mrb[17].mxu1 }
 0x51b   :  { %v551_v58 = vpack.c.bf16 %v542_v2, %v542_v2  ;;  %v544_v59 = vpop.f32.mrb[18].mxu1 }
 0x51c   :  { %v568_v60 = vsel %vm69_vm0, %v550_v57, 0  ;;  %v545_v61 = vpop.f32.mrb[19].mxu1 }
 0x51d   :  { %713 = vmatprep.subr.msk.bf16.mxu1 %vm69_vm0, %v551_v58 }
 0x51e   :  { %615 = vmatpush1.bf16.msra.mxu1 %v568_v60 }
 0x521   :  { %714 = vmatmul.mubr.msk.bf16.vlgmr.msra.gmra.mrb[20].mxu1 %vm62_vm1, %v547_v55 }
 0x5ec   :  { %v607_v3 = vpop.f32.mrb[20].mxu0 }
 0x5ed   :  { %v608_v5 = vadd.f32 %v607_v3, %v556_v63  ;;  %v609_v6 = vpop.f32.mrb[21].mxu0 }
 0x5ee   :  { %v610_v7 = vadd.f32 %v609_v6, %v556_v63  ;;  %v611_v8 = vpop.f32.mrb[22].mxu0 }
 0x5ef   :  { %v661_v9 = vadd.f32 %v657_v62, %v608_v5  ;;  %v612_v10 = vpop.f32.mrb[23].mxu0 }
 0x5f0   :  { %v662_v11 = vadd.f32 %v658_v4, %v610_v7 }
 0x5f1   :  { %v665_v12 = vmax.f32 %v661_v9, 0.0 }
 0x5f2   :  { %v666_v13 = vmax.f32 %v662_v11, 0.0 }
 0x5f4   :  { %v717_v19 = vpack.c.bf16 %v666_v13, %v665_v12  ;;  %v648_v20 = vpop.f32.mrb[20].mxu1 }
 0x5f5   :  { %v649_v22 = vadd.f32 %v648_v20, %v556_v63  ;;  %v650_v23 = vpop.f32.mrb[21].mxu1 }
 0x5f6   :  { %685 = vst [vmem:[%s878_s5] sm:$0xff] %v717_v19  ;;  %v651_v0 = vadd.f32 %v650_v23, %v556_v63  ;;  %v652_v24 = vpop.f32.mrb[22].mxu1 }
 0x5f7   :  { %v663_v25 = vadd.f32 %v659_v18, %v649_v22  ;;  %v653_v26 = vpop.f32.mrb[23].mxu1 }
 0x5f8   :  { %v664_v27 = vadd.f32 %v660_v21, %v651_v0 }
 0x5f9   :  { %v667_v28 = vmax.f32 %v663_v25, 0.0 }
 0x5fa   :  { %v668_v29 = vmax.f32 %v664_v27, 0.0 }
 0x5fc   :  { %v718_v14 = vpack.c.bf16 %v668_v29, %v667_v28 }
 0x5fe   :  { %686 = vst [vmem:[%s878_s5 + $0x8] sm:$0xff] %v718_v14 }

</bundles_post_ra>
